<compile_context>
chip_gen: v7x
topology: tpu7x:2x2x1
jax: 0.10.0
libtpu: 0.0.40
codegen_flags: <defaults>
</compile_context>

<pallas_src>
import functools

import jax
import jax.numpy as jnp
from jax.experimental import pallas as pl
from jax.experimental.pallas import tpu as pltpu


def _round_up(x, m):
    return ((x + m - 1) // m) * m


def _dense_block_kernel(x_ref, wx_ref, wp_ref, b_ref, o_ref, *,
                        growth_rate, num_layers):
    """Fused DenseBlock forward on one batch tile (producer-side dataflow).

    x_ref  : [tile_b, in]          input features (compute dtype)
    wx_ref : [in, L*G]             rows of every W_l that multiply x, stacked
                                   along columns (compute dtype)
    wp_ref : [max(L-1,1), G, L*G]  wp_ref[j][:, l*G:(l+1)*G] = rows of W_l
                                   that multiply y_j (zeros for l <= j)
    b_ref  : [1, L*G]              all biases (f32)
    o_ref  : [tile_b, in + L*G]    concatenated output
    """
    G = growth_rate
    cdtype = wx_ref.dtype
    x = x_ref[...].astype(cdtype)                            # [tb, in]

    # One wide-N MXU pass: x's contribution to every layer's pre-activation,
    # plus every bias, accumulated in f32.
    acc = jnp.dot(x, wx_ref[...],
                  preferred_element_type=jnp.float32)        # [tb, L*G]
    acc = acc + b_ref[...]

    feats = [x]
    for l in range(num_layers):                              # static unroll
        y = jnp.maximum(acc[:, l * G:(l + 1) * G], 0.0)      # bias+ReLU in f32
        feats.append(y.astype(cdtype))
        if l + 1 < num_layers:
            # Rank-G producer update: push y_l into every future layer's
            # pre-activation. Columns of layers <= l are zero in wp_ref[l],
            # so already-consumed blocks are untouched (no stale/NaN reads).
            acc = acc + jnp.dot(y.astype(cdtype), wp_ref[l],
                                preferred_element_type=jnp.float32)

    # Single store of the concatenated [x, y_0, ..., y_{L-1}] tile.
    o_ref[...] = jnp.concatenate(feats, axis=1).astype(o_ref.dtype)


def init_dense_block_params(key, in_features, growth_rate, num_layers,
                            dtype=jnp.float32):
    """Synthetic params with nn.Linear shapes (weights pre-transposed for x @ W)."""
    params = []
    for i in range(num_layers):
        fan_in = in_features + i * growth_rate
        key, kw, kb = jax.random.split(key, 3)
        bound = 1.0 / float(fan_in) ** 0.5
        w = jax.random.uniform(kw, (fan_in, growth_rate), dtype,
                               minval=-bound, maxval=bound)
        b = jax.random.uniform(kb, (growth_rate,), dtype,
                               minval=-bound, maxval=bound)
        params.append((w, b))
    return params


def pack_dense_block_params(params, in_features, growth_rate,
                            compute_dtype=jnp.bfloat16):
    """Producer-side packing.

    wx[:, l*G:(l+1)*G]    = W_l[:in, :]                       (x rows)
    wp[j][:, l*G:(l+1)*G] = W_l[in + j*G : in + (j+1)*G, :]   (y_j rows), l > j
    b_all[0, l*G:(l+1)*G] = b_l
    """
    L = len(params)
    G = growth_rate
    NG = L * G
    wx = jnp.zeros((in_features, NG), jnp.float32)
    wp = jnp.zeros((max(L - 1, 1), G, NG), jnp.float32)
    b_all = jnp.zeros((1, NG), jnp.float32)
    for l, (w, b) in enumerate(params):
        w = w.astype(jnp.float32)
        wx = wx.at[:, l * G:(l + 1) * G].set(w[:in_features, :])
        b_all = b_all.at[0, l * G:(l + 1) * G].set(b.astype(jnp.float32))
        for j in range(l):
            rows = w[in_features + j * G: in_features + (j + 1) * G, :]
            wp = wp.at[j, :, l * G:(l + 1) * G].set(rows)
    return wx.astype(compute_dtype), wp.astype(compute_dtype), b_all


def dense_block_forward(x, wx, wp, b_all, in_features, growth_rate,
                        num_layers, *, tile_b=None):
    """Returns concat([x, f1, ..., fL], axis=1): [B, in_features + L*growth]."""
    B = x.shape[0]
    G = growth_rate
    NG = num_layers * G
    total = in_features + NG
    assert num_layers >= 1
    assert wx.shape == (in_features, NG)
    assert wp.shape[1:] == (G, NG)
    compute_dtype = wx.dtype
    x = x.astype(compute_dtype)

    # Batch tiling: <=256 fills the v6e/v7x MXU M dimension; ragged batches
    # are zero-padded (relu(b) garbage rows are sliced off after the call).
    if tile_b is None:
        tile_b = min(256, _round_up(B, 8))
    B_pad = _round_up(B, tile_b)
    if B_pad != B:
        x = jnp.pad(x, ((0, B_pad - B), (0, 0)))
    grid = (B_pad // tile_b,)

    itemsize = jnp.dtype(compute_dtype).itemsize
    weight_bytes = (wx.size + wp.size) * itemsize + b_all.size * 4
    # Scheduling hint for XLA around the custom call.
    flops = sum(2 * B_pad * (in_features + l * G) * G for l in range(num_layers))
    bytes_accessed = weight_bytes + B_pad * (in_features + total) * itemsize
    # Explicit VMEM budget (v7x has only 64 MiB/TC): double-buffered x/out
    # tiles + resident weights + f32 accumulator headroom.
    est_vmem = (2 * tile_b * (in_features + total) * itemsize
                + 2 * weight_bytes
                + 4 * tile_b * NG * 4)
    vmem_limit = int(min(96 * 2**20, max(32 * 2**20, 2 * est_vmem)))

    kernel = functools.partial(_dense_block_kernel,
                               growth_rate=growth_rate,
                               num_layers=num_layers)

    out = pl.pallas_call(
        kernel,
        out_shape=jax.ShapeDtypeStruct((B_pad, total), compute_dtype),
        grid_spec=pltpu.PrefetchScalarGridSpec(
            num_scalar_prefetch=0,
            grid=grid,
            in_specs=[
                pl.BlockSpec((tile_b, in_features), lambda i: (i, 0)),
                pl.BlockSpec(wx.shape, lambda i: (0, 0)),      # resident
                pl.BlockSpec(wp.shape, lambda i: (0, 0, 0)),   # resident
                pl.BlockSpec(b_all.shape, lambda i: (0, 0)),   # resident
            ],
            out_specs=pl.BlockSpec((tile_b, total), lambda i: (i, 0)),
        ),
        compiler_params=pltpu.CompilerParams(
            dimension_semantics=("parallel",),
            vmem_limit_bytes=vmem_limit),
        cost_estimate=pl.CostEstimate(flops=flops, transcendentals=0,
                                      bytes_accessed=bytes_accessed),
    )(x, wx, wp, b_all)

    return out[:B] if B_pad != B else out


def dense_block_reference(x, params):
    """Pure-JAX f32 reference mirroring the PyTorch module."""
    inputs = [x]
    for (w, b) in params:
        cat = jnp.concatenate(inputs, axis=1)
        inputs.append(jnp.maximum(cat @ w + b, 0.0))
    return jnp.concatenate(inputs, axis=1)


if __name__ == "__main__":
    batch = 8
    in_features = 32
    growth_rate = 16
    num_layers = 3

    key = jax.random.PRNGKey(0)
    key, kx = jax.random.split(key)
    x = jax.random.normal(kx, (batch, in_features), jnp.float32)
    params = init_dense_block_params(key, in_features, growth_rate, num_layers)

    total = in_features + num_layers * growth_rate
    ref = jax.block_until_ready(dense_block_reference(x, params))

    # --- f32 weights: tight correctness check against the pure-JAX reference.
    wx32, wp32, b32 = pack_dense_block_params(params, in_features, growth_rate,
                                              compute_dtype=jnp.float32)
    out_f32 = jax.block_until_ready(
        dense_block_forward(x, wx32, wp32, b32, in_features, growth_rate,
                            num_layers))
    assert out_f32.shape == (batch, total), out_f32.shape
    assert jnp.allclose(out_f32, ref, atol=1e-4, rtol=1e-4), "f32 mismatch"

    # --- bf16 weights/activations (default, MXU-native), f32 accumulation.
    # NOTE: intermediate features are stored in bf16 and fed to later layers,
    # so error compounds with depth vs the f32 reference — intentional
    # precision/perf trade-off, hence the loose tolerance.
    wxb, wpb, bb = pack_dense_block_params(params, in_features, growth_rate,
                                           compute_dtype=jnp.bfloat16)
    out_bf16 = jax.block_until_ready(
        dense_block_forward(x, wxb, wpb, bb, in_features, growth_rate,
                            num_layers))
    assert out_bf16.shape == (batch, total), out_bf16.shape
    assert jnp.allclose(out_bf16.astype(jnp.float32), ref,
                        atol=1e-1, rtol=1e-1), "bf16 mismatch"

    print("KERNEL_OK")
</pallas_src>

<mosaic_0001>
module attributes {stable_mosaic.version = 11 : i64} {
  func.func @_dense_block_kernel(%arg0: i32, %arg1: memref<8x32xf32, #tpu.memory_space<vmem>>, %arg2: memref<32x48xf32, #tpu.memory_space<vmem>>, %arg3: memref<2x16x48xf32, #tpu.memory_space<vmem>>, %arg4: memref<1x48xf32, #tpu.memory_space<vmem>>, %arg5: memref<8x80xf32, #tpu.memory_space<vmem>>) attributes {dimension_semantics = [#tpu.dimension_semantics<parallel>], iteration_bounds = array<i64: 1>, scalar_prefetch = 0 : i64, scratch_operands = 0 : i64, tpu.core_type = #tpu.core_type<tc>, window_params = [{transform_indices = @transform_0, window_bounds = array<i64: 8, 32>}, {pipeline_mode = #tpu.pipeline_mode<synchronous>, transform_indices = @transform_1, window_bounds = array<i64: 32, 48>}, {pipeline_mode = #tpu.pipeline_mode<synchronous>, transform_indices = @transform_2, window_bounds = array<i64: 2, 16, 48>}, {pipeline_mode = #tpu.pipeline_mode<synchronous>, transform_indices = @transform_3, window_bounds = array<i64: 1, 48>}, {transform_indices = @transform_4, window_bounds = array<i64: 8, 80>}]} {
    %c0 = arith.constant 0 : index
    %c0_0 = arith.constant 0 : index
    %0 = vector.load %arg1[%c0, %c0_0] : memref<8x32xf32, #tpu.memory_space<vmem>>, vector<8x32xf32>
    %c0_1 = arith.constant 0 : index
    %c0_2 = arith.constant 0 : index
    %1 = vector.load %arg2[%c0_1, %c0_2] : memref<32x48xf32, #tpu.memory_space<vmem>>, vector<32x48xf32>
    %cst = arith.constant dense<0.000000e+00> : vector<8x48xf32>
    %2 = tpu.matmul %0, %1, %cst {dimension_numbers = #tpu.dot_dimension_numbers<[1], [0], [0], [1], [0, 0, 1, 1], [], []>} : vector<8x32xf32>, vector<32x48xf32>, vector<8x48xf32> -> vector<8x48xf32>
    %c0_3 = arith.constant 0 : index
    %c0_4 = arith.constant 0 : index
    %3 = vector.load %arg4[%c0_3, %c0_4] : memref<1x48xf32, #tpu.memory_space<vmem>>, vector<1x48xf32>
    %4 = vector.broadcast %3 : vector<1x48xf32> to vector<8x48xf32>
    %5 = arith.addf %2, %4 : vector<8x48xf32>
    %6 = vector.extract_strided_slice %5 {offsets = [0, 0], sizes = [8, 16], strides = [1, 1]} : vector<8x48xf32> to vector<8x16xf32>
    %cst_5 = arith.constant 0.000000e+00 : f32
    %7 = vector.broadcast %cst_5 : f32 to vector<8x16xf32>
    %8 = arith.maximumf %6, %7 : vector<8x16xf32>
    %c0_6 = arith.constant 0 : index
    %c0_7 = arith.constant 0 : index
    %c0_8 = arith.constant 0 : index
    %9 = vector.load %arg3[%c0_6, %c0_7, %c0_8] : memref<2x16x48xf32, #tpu.memory_space<vmem>>, vector<1x16x48xf32>
    %10 = vector.shape_cast %9 : vector<1x16x48xf32> to vector<16x48xf32>
    %cst_9 = arith.constant dense<0.000000e+00> : vector<8x48xf32>
    %11 = tpu.matmul %8, %10, %cst_9 {dimension_numbers = #tpu.dot_dimension_numbers<[1], [0], [0], [1], [0, 0, 1, 1], [], []>} : vector<8x16xf32>, vector<16x48xf32>, vector<8x48xf32> -> vector<8x48xf32>
    %12 = arith.addf %5, %11 : vector<8x48xf32>
    %13 = vector.extract_strided_slice %12 {offsets = [0, 16], sizes = [8, 16], strides = [1, 1]} : vector<8x48xf32> to vector<8x16xf32>
    %cst_10 = arith.constant 0.000000e+00 : f32
    %14 = vector.broadcast %cst_10 : f32 to vector<8x16xf32>
    %15 = arith.maximumf %13, %14 : vector<8x16xf32>
    %c1 = arith.constant 1 : index
    %c0_11 = arith.constant 0 : index
    %c0_12 = arith.constant 0 : index
    %16 = vector.load %arg3[%c1, %c0_11, %c0_12] : memref<2x16x48xf32, #tpu.memory_space<vmem>>, vector<1x16x48xf32>
    %17 = vector.shape_cast %16 : vector<1x16x48xf32> to vector<16x48xf32>
    %cst_13 = arith.constant dense<0.000000e+00> : vector<8x48xf32>
    %18 = tpu.matmul %15, %17, %cst_13 {dimension_numbers = #tpu.dot_dimension_numbers<[1], [0], [0], [1], [0, 0, 1, 1], [], []>} : vector<8x16xf32>, vector<16x48xf32>, vector<8x48xf32> -> vector<8x48xf32>
    %19 = arith.addf %12, %18 : vector<8x48xf32>
    %20 = vector.extract_strided_slice %19 {offsets = [0, 32], sizes = [8, 16], strides = [1, 1]} : vector<8x48xf32> to vector<8x16xf32>
    %cst_14 = arith.constant 0.000000e+00 : f32
    %21 = vector.broadcast %cst_14 : f32 to vector<8x16xf32>
    %22 = arith.maximumf %20, %21 : vector<8x16xf32>
    %23 = tpu.concatenate %0, %8, %15, %22 in 1 : vector<8x32xf32>, vector<8x16xf32>, vector<8x16xf32>, vector<8x16xf32> -> vector<8x80xf32>
    %c0_15 = arith.constant 0 : index
    %c0_16 = arith.constant 0 : index
    %24 = vector.load %arg5[%c0_15, %c0_16] : memref<8x80xf32, #tpu.memory_space<vmem>>, vector<8x80xf32>
    tpu.vector_store %arg5[%c0_15, %c0_16], %23 {strides = array<i32>} : memref<8x80xf32, #tpu.memory_space<vmem>>, vector<8x80xf32>,
    return
  }
  func.func @transform_0(%arg0: i32) -> (i32, i32) {
    %c0_i32 = arith.constant 0 : i32
    %c0_i32_0 = arith.constant 0 : i32
    return %arg0, %c0_i32 : i32, i32
  }
  func.func @transform_1(%arg0: i32) -> (i32, i32) {
    %c0_i32 = arith.constant 0 : i32
    %c0_i32_0 = arith.constant 0 : i32
    %c0_i32_1 = arith.constant 0 : i32
    return %c0_i32, %c0_i32_0 : i32, i32
  }
  func.func @transform_2(%arg0: i32) -> (i32, i32, i32) {
    %c0_i32 = arith.constant 0 : i32
    %c0_i32_0 = arith.constant 0 : i32
    %c0_i32_1 = arith.constant 0 : i32
    %c0_i32_2 = arith.constant 0 : i32
    return %c0_i32, %c0_i32_0, %c0_i32_1 : i32, i32, i32
  }
  func.func @transform_3(%arg0: i32) -> (i32, i32) {
    %c0_i32 = arith.constant 0 : i32
    %c0_i32_0 = arith.constant 0 : i32
    %c0_i32_1 = arith.constant 0 : i32
    return %c0_i32, %c0_i32_0 : i32, i32
  }
  func.func @transform_4(%arg0: i32) -> (i32, i32) {
    %c0_i32 = arith.constant 0 : i32
    %c0_i32_0 = arith.constant 0 : i32
    return %arg0, %c0_i32 : i32, i32
  }
}

</mosaic_0001>

<bundles_post_ra>
// kernel: tpu_custom_call.1
= control target key start
LH: loop header
LB: loop body
LE: loop exit
PB: predicated region body
PF: predicated region fallthrough
CT: control target
= control target key end

     0   :  { %9 = vsyncpa [#allocation3], 0  ;;  %s592_s0 = inlined_call_operand.hbm [shape: f32[8,32], index: 0, kind: input, shape index: {}]   ;;  %s593_s1 = inlined_call_operand.hbm [shape: f32[32,48], index: 1, kind: input, shape index: {}]   ;;  %s594_s2 = inlined_call_operand.hbm [shape: f32[2,16,48], index: 2, kind: input, shape index: {}]   ;;  %s595_s3 = inlined_call_operand.vmem [shape: f32[1,48], index: 3, kind: input, shape index: {}]   ;;  %s596_s4 = inlined_call_operand.hbm [shape: f32[8,80], index: 4, kind: output, shape index: {}]  }
   0x1   :  { %10 = vsyncpa [#allocation6], 0 }
   0x2   :  { %11 = vsyncpa [#allocation4], 0  ;;  %s492_s15 = smov [#allocation5]   ;;  %s398_s19 = scalar_lea.hbm %s593_s1, 512 }
   0x3   :  { %s27_s16 = sshll.u32 %s492_s15, 4  ;;  %p399_p0 = scmp.ne.s32.totalorder %s593_s1, %s398_s19  ;;  %s28_s16 = int_to_ptr.vmem [resolvable:$true] %s27_s16 }
   0x4   :  { %p402_p1 = scmp.lt.u32.totalorder %s398_s19, %s593_s1 }
   0x6   :  { %p404_p2 = pnand %p402_p1, %p399_p0 }
   0x8   :  { %407 = shalt.err (!%p404_p2)
}
   0x9   :  { %s408_s24 = scalar_lea.vmem %s28_s16, 512  ;;  %p413_p4 = scmp.lt.s32.totalorder %s28_s16, %s28_s16 }
   0xa   :  { %p409_p3 = scmp.ne.s32.totalorder %s28_s16, %s408_s24  ;;  %p414_p5 = scmp.lt.s32.totalorder %s408_s24, %s408_s24 }
   0xc   :  { %p415_p6 = por %p414_p5, %p413_p4 }
   0xe   :  { %p416_p7 = pnand %p415_p6, %p409_p3 }
  0x10   :  { %419 = shalt.err (!%p416_p7)
}
  0x11   :  { %s493_s25 = smov 128   ;;  %s494_s26 = smov 8  }
  0x12   :  { %33 = dma.hbm_to_vmem [thread:$0]  %s593_s1, 512, %s28_s16, [#allocation6], %s493_s25, %s493_s25, %s494_s26  }
  0x13   :  { %s495_s29 = smov [#allocation2]   ;;  %s496_s5 = smov [#allocation7]  }
  0x14   :  { %s18_s30 = sshll.u32 %s495_s29, 4  ;;  %s39_s6 = sshll.u32 %s496_s5, 4  ;;  %s19_s30 = int_to_ptr.vmem [resolvable:$true] %s18_s30  ;;  %s40_s6 = int_to_ptr.vmem [resolvable:$true] %s39_s6 }
  0x15   :  { %s420_s9 = scalar_lea.hbm %s592_s0, 128 }
  0x16   :  { %p421_p8 = scmp.ne.s32.totalorder %s592_s0, %s420_s9  ;;  %p424_p9 = scmp.lt.u32.totalorder %s420_s9, %s592_s0 }
  0x18   :  { %p426_p10 = pnand %p424_p9, %p421_p8 }
  0x1a   :  { %429 = shalt.err (!%p426_p10)
}
  0x1b   :  { %s430_s1 = scalar_lea.vmem %s19_s30, 128  ;;  %p435_p12 = scmp.lt.s32.totalorder %s19_s30, %s19_s30 }
  0x1c   :  { %p431_p11 = scmp.ne.s32.totalorder %s19_s30, %s430_s1  ;;  %p436_p13 = scmp.lt.s32.totalorder %s430_s1, %s430_s1 }
  0x1e   :  { %p437_p0 = por %p436_p13, %p435_p12 }
  0x20   :  { %p438_p1 = pnand %p437_p0, %p431_p11 }
  0x22   :  { %441 = shalt.err (!%p438_p1)
}
  0x23   :  { %21 = dma.hbm_to_vmem [thread:$0]  %s592_s0, 128, %s19_s30, [#allocation3]  }
  0x24   :  { %s442_s18 = scalar_lea.hbm %s594_s2, 512 }
  0x25   :  { %p443_p2 = scmp.ne.s32.totalorder %s594_s2, %s442_s18  ;;  %p446_p3 = scmp.lt.u32.totalorder %s442_s18, %s594_s2 }
  0x27   :  { %p448_p4 = pnand %p446_p3, %p443_p2 }
  0x29   :  { %451 = shalt.err (!%p448_p4)
}
  0x2a   :  { %s452_s23 = scalar_lea.vmem %s40_s6, 512  ;;  %p457_p6 = scmp.lt.s32.totalorder %s40_s6, %s40_s6 }
  0x2b   :  { %p453_p5 = scmp.ne.s32.totalorder %s40_s6, %s452_s23  ;;  %p458_p7 = scmp.lt.s32.totalorder %s452_s23, %s452_s23 }
  0x2d   :  { %p459_p8 = por %p458_p7, %p457_p6 }
  0x2f   :  { %p460_p9 = pnand %p459_p8, %p453_p5 }
  0x31   :  { %463 = shalt.err (!%p460_p9)
}
  0x32   :  { %45 = dma.hbm_to_vmem [thread:$0]  %s594_s2, 512, %s40_s6, [#allocation6], %s493_s25, %s493_s25, %s494_s26  }
  0x33   :  { %486 = dma.done.wait [#allocation3], 128  }
  0x34   :  { %487 = vsyncadd [#allocation3], 4294967168 }
  0x35   :  { %488 = dma.done.wait [#allocation6], 1024  }
  0x36   :  { %489 = vsyncadd [#allocation6], 4294966272  ;;  %v497_v0 = vmov 0.0|0.0   ;;  %vm498_vm0 = vmmov 0   ;;  %v499_v1 = vmov 0.0   ;;  %v58_v2 = vld [vmem:[#allocation5] sm:$0xff] }
  0x37   :  { %375 = vmatprep.subr.bf16.mxu0 %v497_v0  ;;  %358 = vmatprep.mubr.msk.f32.mxu0 %vm498_vm0, %v499_v1  ;;  %v59_v3 = vld [vmem:[#allocation5 + $0x8] sm:$0xff]  ;;  %v60_v4 = vld [vmem:[#allocation5 + $0x10] sm:$0xff]  ;;  %v61_v6 = vld [vmem:[#allocation5 + $0x18] sm:$0xff]  ;;  %vm69_vm1 = vcmask 261120   ;;  %vm146_vm2 = vcmask 130048   ;;  %s500_s26 = smov 32  }
  0x38   :  { %381 = vmatprep.subr.bf16.mxu1 %v497_v0  ;;  %365 = vmatprep.mubr.msk.f32.mxu1 %vm498_vm0, %v499_v1  ;;  %v376_v5 = vpack.c.bf16 %v59_v3, %v58_v2  ;;  %v379_v7 = vpack.c.bf16 %v61_v6, %v60_v4  ;;  %v57_v8 = vld [vmem:[#allocation2] sm:$0xff]  ;;  %v144_v9 = vld [vmem:[#allocation7] sm:$0xff]  ;;  %v145_v10 = vld [vmem:[#allocation7 + $0x8] sm:$0xff]  ;;  %vm313_vm3 = vcmask 392192   ;;  %s502_s27 = smov [#allocation8]   ;;  %vm315_vm4 = vcmask 523264  }
  0x39   :  { %v382_v11 = vpack.c.bf16 %v145_v10, %v144_v9  ;;  %v335_v12 = vld [vmem:[%s595_s3] ss:$0 sm:$0xff]  ;;  %v223_v17 = vld [vmem:[#allocation7 + $0x10] sm:$0xff]  ;;  %s501_s3 = smov 112   ;;  %s325_s28 = sshll.u32 %s502_s27, 4  ;;  %vm317_vm5 = vcmask 654336   ;;  %s326_s28 = int_to_ptr.vmem [resolvable:$true] %s325_s28 }
  0x3a   :  { %377 = vmatpush3.bf16.msra.mxu0 %v376_v5  ;;  %v224_v18 = vld [vmem:[#allocation7 + $0x18] sm:$0xff]  ;;  %s464_s29 = scalar_lea.vmem %s326_s28, 128  ;;  %p469_p11 = scmp.lt.s32.totalorder %s326_s28, %s326_s28 }
  0x3b   :  { %378 = vmatprep.subr.bf16.mxu0 %v497_v0  ;;  %383 = vmatpush3.bf16.msra.mxu1 %v382_v11  ;;  %v385_v19 = vpack.c.bf16 %v224_v18, %v223_v17  ;;  %p465_p10 = scmp.ne.s32.totalorder %s326_s28, %s464_s29  ;;  %p470_p12 = scmp.lt.s32.totalorder %s464_s29, %s464_s29 }
  0x3c   :  { %384 = vmatprep.subr.bf16.mxu1 %v497_v0 }
  0x3d   :  { %p471_p13 = por %p470_p12, %p469_p11 }
  0x3e   :  { %380 = vmatpush3.bf16.msra.mxu0 %v379_v7 }
  0x3f   :  { %p472_p0 = pnand %p471_p13, %p465_p10 }
  0x41   :  { %359 = vmatmul.mubr.msk.f32.vlgmr.msra.gmra.mrb[0].mxu0 %vm69_vm1, %v57_v8 }
 0x114   :  { %v139_v13 = vpop.f32.mrb[0].mxu0 }
 0x115   :  { %v140_v14 = vadd.f32 %v335_v12, %v139_v13  ;;  %v360_v15 = vpop.f32.mrb[1].mxu0 }
 0x117   :  { %v143_v16 = vmax.f32 %v140_v14, 0.0 }
 0x119   :  { %366 = vmatmul.mubr.msk.f32.vlgmr.msra.gmra.mrb[0].mxu1 %vm146_vm2, %v143_v16 }
 0x11a   :  { %372 = vmatprep.mubr.msk.f32.mxu1 %vm498_vm0, %v499_v1  ;;  %386 = vmatpush3.bf16.msra.mxu1 %v385_v19 }
 0x1ec   :  { %v216_v20 = vpop.f32.mrb[0].mxu1 }
 0x1ed   :  { %v220_v21 = vadd.f32 %v216_v20, %v140_v14  ;;  %v367_v22 = vpop.f32.mrb[1].mxu1 }
 0x1ef   :  { %v221_v23 = vmax.f32 %v220_v21, 0.0 }
 0x1f1   :  { %305 = vrot.lane.b32.xlu1 %v221_v23, %s500_s26  ;;  %226 = vrot.lane.b32.xlu0 %v221_v23, %s501_s3 }
 0x1f5   :  { %302 = vrot.lane.b32.xlu0 %v143_v16, %s500_s26 }
 0x263   :  { %v227_v24 = vpop.permute.xlu0 %226  ;;  %v306_v30 = vpop.permute.xlu1 %305 }
 0x264   :  { %373 = vmatmul.mubr.msk.f32.vlgmr.msra.gmra.mrb[2].mxu1 %vm146_vm2, %v227_v24 }
 0x267   :  { %v303_v29 = vpop.permute.xlu0 %302 }
 0x268   :  { %v312_v31 = vsel %vm69_vm1, %v57_v8, %v303_v29 }
 0x269   :  { %v314_v32 = vsel %vm313_vm3, %v312_v31, %v306_v30 }
 0x337   :  { %v296_v25 = vpop.f32.mrb[2].mxu1 }
 0x338   :  { %v300_v26 = vadd.f32 %v296_v25, %v220_v21  ;;  %v374_v27 = vpop.f32.mrb[3].mxu1 }
 0x33a   :  { %v301_v28 = vmax.f32 %v300_v26, 0.0 }
 0x33c   :  { %309 = vrot.lane.b32.xlu1 %v301_v28, %s500_s26 }
 0x3ae   :  { %v310_v33 = vpop.permute.xlu1 %309 }
 0x3af   :  { %v316_v34 = vsel %vm315_vm4, %v314_v32, %v310_v33 }
 0x3b0   :  { %318 = vst.msk [vmem:[#allocation8] sm:$0xff] %vm317_vm5, %v316_v34 }
 0x3b1   :  { %475 = shalt.err (!%p472_p0)
}
 0x3b2   :  { %s476_s6 = scalar_lea.hbm %s596_s4, 128 }
 0x3b3   :  { %p477_p1 = scmp.ne.s32.totalorder %s596_s4, %s476_s6  ;;  %p480_p2 = scmp.lt.u32.totalorder %s476_s6, %s596_s4 }
 0x3b5   :  { %p482_p3 = pnand %p480_p2, %p477_p1 }
 0x3b7   :  { %485 = shalt.err (!%p482_p3)
}
 0x3b8   :  { %328 = dma.vmem_to_hbm [thread:$0]  %s326_s28, 128, %s596_s4, [#allocation4]  }
 0x3b9   :  { %490 = dma.done.wait [#allocation4], 128  }
 0x3ba   :  { %491 = vsyncadd [#allocation4], 4294967168 }
 0x3bb   :  { %332 = vsyncpa [#allocation3], 1 }
 0x3bc   :  { %333 = vsyncpa [#allocation6], 1 }
 0x3bd   :  { %334 = vsyncpa [#allocation4], 1 }

</bundles_post_ra>
